<compile_context>
chip_gen: v5e
topology: v5e:2x2
jax: 0.10.0
libtpu: 0.0.40
codegen_flags: <defaults>
</compile_context>

<pallas_src>
import jax
import jax.numpy as jnp
from jax import lax
from jax.experimental import pallas as pl
from jax.experimental.pallas import tpu as pltpu


def _channel_attention_kernel(beta_ref, x_ref, o_ref):
    # beta_ref: (1,) f32 scalar in SMEM; x_ref/o_ref block: (Bt, C, HWp).
    beta = beta_ref[0]
    x = x_ref[...]                                   # (Bt, C, HWp) in input dtype
    xb = x.astype(jnp.bfloat16)                      # bf16 operands for the MXU

    # Gram over channels (contract the spatial/lane axis): (Bt, C, C), symmetric.
    gram = jnp.einsum(
        "bcp,bdp->bcd", xb, xb, preferred_element_type=jnp.float32
    )

    # Column-wise softmax of the symmetric gram gives soft^T directly
    # (soft^T[a, c] == softmax(gram, -1)[c, a]), avoiding any (C, C) transpose.
    m = jnp.max(gram, axis=-2, keepdims=True)        # (Bt, 1, C)
    e = jnp.exp(gram - m)
    s = jnp.sum(e, axis=-2, keepdims=True)           # (Bt, 1, C)
    soft_t = e * pl.reciprocal(s, approx=True)       # (Bt, C, C) == soft^T

    # attn^T = rowmax(soft)^T - soft^T ; rowmax(soft)^T == column-max of soft^T.
    attn_t = jnp.max(soft_t, axis=-2, keepdims=True) - soft_t   # (Bt, C, C)

    # Fused epilogue: out = (I + beta * attn^T) @ x  ==  x + beta * attn^T @ x.
    c = attn_t.shape[-1]
    eye = (
        lax.broadcasted_iota(jnp.int32, (c, c), 0)
        == lax.broadcasted_iota(jnp.int32, (c, c), 1)
    ).astype(jnp.float32)
    m_t = eye[None] + beta * attn_t                  # (Bt, C, C) f32

    out = jnp.einsum(
        "bcd,bdp->bcp",
        m_t.astype(jnp.bfloat16),
        xb,
        preferred_element_type=jnp.float32,
    )
    o_ref[...] = out.astype(o_ref.dtype)


def _vmem_limit_bytes():
    """Generation-aware scoped-VMEM limit (3/4 of physical, conservative fallback)."""
    default = 48 * 1024 * 1024
    try:
        cap = int(pltpu.get_tpu_info().vmem_capacity_bytes)
        return max(default, (cap * 3) // 4)
    except Exception:
        return default


def _pick_bt(b, c, hwp, itemsize, vmem_limit):
    """Batches per grid step: amortize per-step overhead while staying in VMEM."""
    slab = c * hwp
    # double-buffered in + out slabs (input dtype) + bf16 staging + (C,C) f32 temps
    per_batch = slab * (2 * itemsize + 2 * itemsize + 2) + 6 * c * c * 4
    budget = vmem_limit // 2                         # headroom for compiler scratch
    bt = max(1, min(b, budget // max(per_batch, 1)))
    while b % bt:                                    # keep the grid exact
        bt -= 1
    return int(bt)


def channel_attention(x, beta):
    """x: (B, C, H, W) float32, beta: (1,) float32 -> (B, C, H, W)."""
    b, c, h, w = x.shape
    hw = h * w
    hwp = ((hw + 127) // 128) * 128                  # lane-dense last dim
    x_flat = x.reshape(b, c, hw)
    if hwp != hw:
        x_flat = jnp.pad(x_flat, ((0, 0), (0, 0), (0, hwp - hw)))

    vmem_limit = _vmem_limit_bytes()
    bt = _pick_bt(b, c, hwp, x_flat.dtype.itemsize, vmem_limit)

    out_flat = pl.pallas_call(
        _channel_attention_kernel,
        out_shape=jax.ShapeDtypeStruct((b, c, hwp), x.dtype),
        grid=(b // bt,),
        in_specs=[
            pl.BlockSpec(memory_space=pltpu.MemorySpace.SMEM),      # beta scalar
            pl.BlockSpec((bt, c, hwp), lambda i: (i, 0, 0)),        # packed batches
        ],
        out_specs=pl.BlockSpec((bt, c, hwp), lambda i: (i, 0, 0)),
        compiler_params=pltpu.CompilerParams(
            dimension_semantics=("parallel",),
            vmem_limit_bytes=vmem_limit,
        ),
    )(beta, x_flat)

    if hwp != hw:
        out_flat = out_flat[:, :, :hw]
    return out_flat.reshape(b, c, h, w)


def channel_attention_ref(x, beta):
    """Pure-JAX f32 reference mirroring the PyTorch forward."""
    b, c, h, w = x.shape
    xf = x.reshape(b, c, h * w)                      # C / D
    Bm = jnp.transpose(xf, (0, 2, 1))                # (b, hw, c)
    X = jax.nn.softmax(jnp.einsum("bch,bhd->bcd", xf, Bm), axis=-1)
    X = jnp.max(X, axis=-1, keepdims=True) - X
    E = jnp.einsum("bdc,bch->bdh", jnp.transpose(X, (0, 2, 1)), xf)
    return x + beta[0] * E.reshape(b, c, h, w)


if __name__ == "__main__":
    key = jax.random.PRNGKey(0)
    B, C, H, W = 2, 4, 16, 16
    x = jax.random.normal(key, (B, C, H, W), dtype=jnp.float32)

    # nn.Parameter(torch.zeros(1)) -> shape (1,), init 0. Use a nonzero value so
    # the attention path is actually exercised (deterministic, in-script).
    beta = jnp.array([0.5], dtype=jnp.float32)

    out = jax.block_until_ready(channel_attention(x, beta))
    ref = channel_attention_ref(x, beta)
    assert out.shape == (B, C, H, W)
    # bf16 MXU operands + approx reciprocal -> compare at bf16-level tolerance.
    assert jnp.allclose(out, ref, atol=3e-2, rtol=3e-2), "mismatch vs reference"

    # beta = 0 (the module's actual init): identity up to bf16 staging of x
    # (the residual is fused through the bf16 MXU path).
    out0 = jax.block_until_ready(channel_attention(x, jnp.zeros((1,), jnp.float32)))
    assert jnp.allclose(out0, x, atol=2e-2, rtol=2e-2)

    print("KERNEL_OK")
</pallas_src>

<mosaic_0001>
module attributes {stable_mosaic.version = 11 : i64} {
  func.func @_channel_attention_kernel(%arg0: i32, %arg1: memref<1xf32, #tpu.memory_space<smem>>, %arg2: memref<2x4x256xf32, #tpu.memory_space<vmem>>, %arg3: memref<2x4x256xf32, #tpu.memory_space<vmem>>) attributes {dimension_semantics = [#tpu.dimension_semantics<parallel>], iteration_bounds = array<i64: 1>, scalar_prefetch = 0 : i64, scratch_operands = 0 : i64, tpu.core_type = #tpu.core_type<tc>, window_params = [{transform_indices = @transform_0, window_bounds = array<i64: 1>}, {transform_indices = @transform_1, window_bounds = array<i64: 2, 4, 256>}, {transform_indices = @transform_2, window_bounds = array<i64: 2, 4, 256>}]} {
    %c0 = arith.constant 0 : index
    %0 = memref.load %arg1[%c0] : memref<1xf32, #tpu.memory_space<smem>>
    %c0_0 = arith.constant 0 : index
    %c0_1 = arith.constant 0 : index
    %c0_2 = arith.constant 0 : index
    %1 = vector.load %arg2[%c0_0, %c0_1, %c0_2] : memref<2x4x256xf32, #tpu.memory_space<vmem>>, vector<2x4x256xf32>
    %2 = arith.truncf %1 : vector<2x4x256xf32> to vector<2x4x256xbf16>
    "tpu.trace_start"() <{level = 10 : i32, message = "bcp,bdp->bcd"}> : () -> ()
    %cst = arith.constant dense<0.000000e+00> : vector<2x4x4xf32>
    %3 = tpu.matmul %2, %2, %cst {dimension_numbers = #tpu.dot_dimension_numbers<[2], [2], [1], [1], [0, 0, 0, 1, 1, 1], [0], [0]>} : vector<2x4x256xbf16>, vector<2x4x256xbf16>, vector<2x4x4xf32> -> vector<2x4x4xf32>
    "tpu.trace_stop"() : () -> ()
    %cst_3 = arith.constant dense<0xFF800000> : vector<2x4xf32>
    %4 = vector.multi_reduction <maximumf>, %3, %cst_3 [1] : vector<2x4x4xf32> to vector<2x4xf32>
    %5 = vector.shape_cast %4 : vector<2x4xf32> to vector<2x1x4xf32>
    %6 = vector.broadcast %5 : vector<2x1x4xf32> to vector<2x4x4xf32>
    %7 = arith.subf %3, %6 : vector<2x4x4xf32>
    %8 = math.exp %7 : vector<2x4x4xf32>
    %cst_4 = arith.constant dense<0.000000e+00> : vector<2x4xf32>
    %9 = vector.multi_reduction <add>, %8, %cst_4 [1] : vector<2x4x4xf32> to vector<2x4xf32>
    %10 = vector.shape_cast %9 : vector<2x4xf32> to vector<2x1x4xf32>
    %11 = tpu.reciprocal %10 {approx = true} : vector<2x1x4xf32> -> vector<2x1x4xf32>
    %12 = vector.broadcast %11 : vector<2x1x4xf32> to vector<2x4x4xf32>
    %13 = arith.mulf %8, %12 : vector<2x4x4xf32>
    %cst_5 = arith.constant dense<0xFF800000> : vector<2x4xf32>
    %14 = vector.multi_reduction <maximumf>, %13, %cst_5 [1] : vector<2x4x4xf32> to vector<2x4xf32>
    %15 = vector.shape_cast %14 : vector<2x4xf32> to vector<2x1x4xf32>
    %16 = vector.broadcast %15 : vector<2x1x4xf32> to vector<2x4x4xf32>
    %17 = arith.subf %16, %13 : vector<2x4x4xf32>
    %18 = tpu.iota {dimensions = array<i32: 0>} : vector<4x4xi32>
    %19 = tpu.iota {dimensions = array<i32: 1>} : vector<4x4xi32>
    %20 = arith.cmpi eq, %18, %19 : vector<4x4xi32>
    %21 = arith.extui %20 : vector<4x4xi1> to vector<4x4xi32>
    %22 = arith.sitofp %21 : vector<4x4xi32> to vector<4x4xf32>
    %23 = vector.shape_cast %22 : vector<4x4xf32> to vector<1x4x4xf32>
    %24 = vector.broadcast %0 : f32 to vector<2x4x4xf32>
    %25 = arith.mulf %24, %17 : vector<2x4x4xf32>
    %26 = vector.broadcast %23 : vector<1x4x4xf32> to vector<2x4x4xf32>
    %27 = arith.addf %26, %25 : vector<2x4x4xf32>
    %28 = arith.truncf %27 : vector<2x4x4xf32> to vector<2x4x4xbf16>
    "tpu.trace_start"() <{level = 10 : i32, message = "bcd,bdp->bcp"}> : () -> ()
    %cst_6 = arith.constant dense<0.000000e+00> : vector<2x4x256xf32>
    %29 = tpu.matmul %28, %2, %cst_6 {dimension_numbers = #tpu.dot_dimension_numbers<[2], [1], [1], [2], [0, 0, 0, 1, 1, 2], [0], [0]>} : vector<2x4x4xbf16>, vector<2x4x256xbf16>, vector<2x4x256xf32> -> vector<2x4x256xf32>
    "tpu.trace_stop"() : () -> ()
    %c0_7 = arith.constant 0 : index
    %c0_8 = arith.constant 0 : index
    %c0_9 = arith.constant 0 : index
    %30 = vector.load %arg3[%c0_7, %c0_8, %c0_9] : memref<2x4x256xf32, #tpu.memory_space<vmem>>, vector<2x4x256xf32>
    tpu.vector_store %arg3[%c0_7, %c0_8, %c0_9], %29 {strides = array<i32>} : memref<2x4x256xf32, #tpu.memory_space<vmem>>, vector<2x4x256xf32>,
    return
  }
  func.func @transform_0(%arg0: i32) -> i32 {
    %c0_i32 = arith.constant 0 : i32
    %c0_i32_0 = arith.constant 0 : i32
    return %c0_i32 : i32
  }
  func.func @transform_1(%arg0: i32) -> (i32, i32, i32) {
    %c0_i32 = arith.constant 0 : i32
    %c0_i32_0 = arith.constant 0 : i32
    %c0_i32_1 = arith.constant 0 : i32
    return %arg0, %c0_i32, %c0_i32_0 : i32, i32, i32
  }
  func.func @transform_2(%arg0: i32) -> (i32, i32, i32) {
    %c0_i32 = arith.constant 0 : i32
    %c0_i32_0 = arith.constant 0 : i32
    %c0_i32_1 = arith.constant 0 : i32
    return %arg0, %c0_i32, %c0_i32_0 : i32, i32, i32
  }
}

</mosaic_0001>

<bundles_post_ra>
// kernel: tpu_custom_call.1
= control target key start
LH: loop header
LB: loop body
LE: loop exit
PB: predicated region body
PF: predicated region fallthrough
CT: control target
= control target key end

     0   :  { %8 = vsyncpa [#allocation4], 0  ;;  %s398_s0 = inlined_call_operand.<no memory space> [shape: f32[1], index: 0, kind: input, shape index: {}]   ;;  %s399_s1 = inlined_call_operand.hbm [shape: f32[2,4,256], index: 1, kind: input, shape index: {}]   ;;  %s400_s2 = inlined_call_operand.hbm [shape: f32[2,4,256], index: 2, kind: output, shape index: {}]  }
   0x1   :  { %9 = vsyncpa [#allocation5], 0  ;;  %s16_s11 = sshll.u32 %s399_s1, 4  ;;  %s357_s12 = smov [#allocation3]   ;;  %s17_s11 = int_to_ptr.hbm [resolvable:$true] %s16_s11 }
   0x2   :  { %s18_s13 = sshll.u32 %s357_s12, 4  ;;  %s358_s14 = smov 128   ;;  %s19_s13 = int_to_ptr.vmem [resolvable:$true] %s18_s13 }
   0x3   :  { %s359_s15 = smov 8  }
   0x4   :  { %24 = dma.hbm_to_vmem [thread:$0]  %s17_s11, 256, %s19_s13, [#allocation4], %s358_s14, %s358_s14, %s359_s15  }
   0x5   :  { %353 = dma.done.wait [#allocation4], 256  }
   0x6   :  { %354 = vsyncadd [#allocation4], 4294967040  ;;  %v31_v0 = vld [vmem:[#allocation3] sm:$0xff]  ;;  %v32_v1 = vld [vmem:[#allocation3 + $0x8] sm:$0xff]  ;;  %vm114_vm0 = vcmask 27648   ;;  %vm187_vm1 = vcmask 1041408  }
   0x7   :  { %35 = vst [vmem:[#allocation1] ss:$2 sm:$0xff] %v31_v0  ;;  %vm183_vm3 = vcmask 31744   ;;  %vm261_vm4 = vcmask 1043456   ;;  %s274_s20 = sshll.u32 %s400_s2, 4  ;;  %s275_s20 = int_to_ptr.hbm [resolvable:$true] %s274_s20 }
   0x8   :  { %39 = vst [vmem:[#allocation1 + $0x10] ss:$2 sm:$0xff] %v32_v1 }
   0xe   :  { %v36_v2 = vld.sshfl [vmem:[#allocation1] sm:$0xff pattern:$0x75316420]  ;;  %v37_v3 = vld.sshfl [vmem:[#allocation1 + $0x8] sm:$0xff pattern:$0x75316420] }
   0xf   :  { %v46_v4 = vpack.c.bf16 %v37_v3, %v36_v2  ;;  %v40_v5 = vld.sshfl [vmem:[#allocation1 + $0x10] sm:$0xff pattern:$0x75316420]  ;;  %v41_v6 = vld.sshfl [vmem:[#allocation1 + $0x18] sm:$0xff pattern:$0x75316420] }
  0x10   :  { %v47_v7 = vpack.c.bf16 %v41_v6, %v40_v5  ;;  %v169_v5 = vlaneseq }
  0x11   :  { %v49_v8 = vunpack.c.l.b16 %v46_v4  ;;  %v50_v9 = vunpack.c.h.b16 %v46_v4 }
  0x12   :  { %v82_v10 = vunpack.c.l.b16 %v47_v7  ;;  %v83_v11 = vunpack.c.h.b16 %v47_v7 }
  0x13   :  { %v51_v12 = vpack.c.b16 %v49_v8, %v49_v8  ;;  %v52_v13 = vpack.c.b16 %v50_v9, %v50_v9 }
  0x14   :  { %v84_v14 = vpack.c.b16 %v82_v10, %v82_v10  ;;  %v85_v15 = vpack.c.b16 %v83_v11, %v83_v11  ;;  %v170_v11 = vshrl.u32 %v169_v5, 7 }
  0x15   :  { %62 = vmatpush.bf16.xpose.msra.mxu0 %v51_v12  ;;  %75 = vmatpush.bf16.xpose.msra.mxu1 %v52_v13  ;;  %v189_v51 = vsel %vm187_vm1, %v51_v12, 0  ;;  %v192_v53 = vsel %vm187_vm1, %v52_v13, 0 }
  0x16   :  { %95 = vmatpush.bf16.xpose.msra.mxu2 %v84_v14  ;;  %108 = vmatpush.bf16.xpose.msra.mxu3 %v85_v15  ;;  %v224_v49 = vsel %vm187_vm1, %v84_v14, 0  ;;  %v227_v50 = vsel %vm187_vm1, %v85_v15, 0 }
  0x1c   :  { %63 = vmatmul.bf16.vlgmr.msra.gmra.mxu0 %v51_v12  ;;  %76 = vmatmul.bf16.vlgmr.msra.gmra.mxu1 %v52_v13  ;;  %v172_v12 = vand.u32 127, %v169_v5 }
  0x1d   :  { %96 = vmatmul.bf16.vlgmr.msra.gmra.mxu2 %v84_v14  ;;  %109 = vmatmul.bf16.vlgmr.msra.gmra.mxu3 %v85_v15 }
  0x1e   :  { %236 = vmatpush.bf16.msrb.mxu2 %v224_v49  ;;  %249 = vmatpush.bf16.msrb.mxu3 %v227_v50  ;;  %vm173_vm2 = vcmp.eq.s32.totalorder %v170_v11, %v172_v12 }
  0x1f   :  { %201 = vmatpush.bf16.msrb.mxu0 %v189_v51  ;;  %214 = vmatpush.bf16.msrb.mxu1 %v192_v53 }
  0x99   :  { %v64_v16 = vpop.f32.mrf.mxu0  ;;  %v77_v17 = vpop.f32.mrf.mxu1 }
  0x9a   :  { %v78_v18 = vadd.f32 %v77_v17, %v64_v16 }
  0x9c   :  { %v115_v19 = vsel %vm114_vm0, %v78_v18, -inf }
  0x9d   :  { %v116_v20 = vrot.slane %v115_v19, 4 }
  0x9f   :  { %v117_v21 = vmax.f32 %v115_v19, %v116_v20 }
  0xa0   :  { %v97_v22 = vpop.f32.mrf.mxu2  ;;  %v110_v23 = vpop.f32.mrf.mxu3 }
  0xa1   :  { %v118_v24 = vrot.slane %v117_v21, 2  ;;  %v111_v25 = vadd.f32 %v110_v23, %v97_v22  ;;  %v66_v26 = vpop.f32.mrf.mxu0  ;;  %v79_v27 = vpop.f32.mrf.mxu1 }
  0xa3   :  { %v119_v28 = vmax.f32 %v117_v21, %v118_v24  ;;  %v122_v29 = vsel %vm114_vm0, %v111_v25, -inf  ;;  %v360_v21 = vmov 0.0  }
  0xa4   :  { %v123_v30 = vrot.slane %v122_v29, 4  ;;  %v287_v22 = vsel %vm173_vm2, 1.0, %v360_v21 }
  0xa5   :  { %v120_v31 = vrot.slane %v119_v28, 1 }
  0xa6   :  { %v124_v32 = vmax.f32 %v122_v29, %v123_v30 }
  0xa7   :  { %v121_v33 = vmax.f32 %v119_v28, %v120_v31 }
  0xa8   :  { %v125_v34 = vrot.slane %v124_v32, 2  ;;  %v99_v35 = vpop.f32.mrf.mxu2  ;;  %v112_v36 = vpop.f32.mrf.mxu3 }
  0xa9   :  { %v129_v37 = vsub.f32 %v78_v18, %v121_v33  ;;  %v176_v18 = vstv %s398_s0  ;;  %s361_s0 = smov [#allocation6]  }
  0xaa   :  { %v126_v38 = vmax.f32 %v124_v32, %v125_v34  ;;  %s272_s17 = sshll.u32 %s361_s0, 4  ;;  %s273_s17 = int_to_ptr.vmem [resolvable:$true] %s272_s17 }
  0xab   :  { %v131_v39 = vmul.f32 1.442695, %v129_v37 }
  0xac   :  { %v127_v40 = vrot.slane %v126_v38, 1 }
  0xad   :  { %297 = vpow2.f32 %v131_v39 }
  0xae   :  { %v128_v41 = vmax.f32 %v126_v38, %v127_v40 }
  0xb0   :  { %v130_v42 = vsub.f32 %v111_v25, %v128_v41 }
  0xb2   :  { %v133_v43 = vmul.f32 1.442695, %v130_v42 }
  0xb3   :  { %v298_v44 = vpop.eup %297 }
  0xb4   :  { %v135_v45 = vsel %vm114_vm0, %v298_v44, 0.0  ;;  %299 = vpow2.f32 %v133_v43 }
  0xb5   :  { %v136_v46 = vrot.slane %v135_v45, 4 }
  0xb7   :  { %v137_v47 = vadd.f32 %v136_v46, %v135_v45 }
  0xb9   :  { %v138_v48 = vrot.slane %v137_v47, 2 }
  0xba   :  { %v300_v52 = vpop.eup %299 }
  0xbb   :  { %v139_v54 = vadd.f32 %v138_v48, %v137_v47  ;;  %v142_v55 = vsel %vm114_vm0, %v300_v52, 0.0 }
  0xbc   :  { %v143_v56 = vrot.slane %v142_v55, 4 }
  0xbd   :  { %v140_v57 = vrot.slane %v139_v54, 1 }
  0xbe   :  { %v144_v58 = vadd.f32 %v143_v56, %v142_v55 }
  0xbf   :  { %v141_v59 = vadd.f32 %v140_v57, %v139_v54 }
  0xc0   :  { %v145_v60 = vrot.slane %v144_v58, 2 }
  0xc1   :  { %301 = vrcp.f32 %v141_v59 }
  0xc2   :  { %v146_v61 = vadd.f32 %v145_v60, %v144_v58 }
  0xc4   :  { %v147_v62 = vrot.slane %v146_v61, 1 }
  0xc6   :  { %v148_v63 = vadd.f32 %v147_v62, %v146_v61 }
  0xc7   :  { %v302_v0 = vpop.eup %301 }
  0xc8   :  { %v151_v1 = vmul.f32 %v302_v0, %v298_v44  ;;  %303 = vrcp.f32 %v148_v63 }
  0xca   :  { %v153_v2 = vsel %vm114_vm0, %v151_v1, -inf }
  0xcb   :  { %v154_v3 = vrot.slane %v153_v2, 4 }
  0xcd   :  { %v155_v4 = vmax.f32 %v153_v2, %v154_v3 }
  0xce   :  { %v304_v6 = vpop.eup %303 }
  0xcf   :  { %v156_v7 = vrot.slane %v155_v4, 2  ;;  %v152_v8 = vmul.f32 %v304_v6, %v300_v52 }
  0xd1   :  { %v157_v9 = vmax.f32 %v155_v4, %v156_v7  ;;  %v160_v10 = vsel %vm114_vm0, %v152_v8, -inf }
  0xd2   :  { %v161_v13 = vrot.slane %v160_v10, 4 }
  0xd3   :  { %v158_v14 = vrot.slane %v157_v9, 1 }
  0xd4   :  { %v162_v15 = vmax.f32 %v160_v10, %v161_v13 }
  0xd5   :  { %v159_v16 = vmax.f32 %v157_v9, %v158_v14 }
  0xd6   :  { %v163_v17 = vrot.slane %v162_v15, 2 }
  0xd7   :  { %v167_v19 = vsub.f32 %v159_v16, %v151_v1 }
  0xd8   :  { %v164_v20 = vmax.f32 %v162_v15, %v163_v17 }
  0xd9   :  { %v177_v23 = vmul.f32 %v176_v18, %v167_v19 }
  0xda   :  { %v165_v24 = vrot.slane %v164_v20, 1 }
  0xdb   :  { %v179_v25 = vadd.f32 %v287_v22, %v177_v23 }
  0xdc   :  { %v166_v26 = vmax.f32 %v164_v20, %v165_v24 }
  0xdd   :  { %v181_v27 = vpack.c.bf16 %v179_v25, %v179_v25 }
  0xde   :  { %v168_v28 = vsub.f32 %v166_v26, %v152_v8 }
  0xdf   :  { %288 = vmatmul.msk.bf16.vlgmr.msrb.gmra.mxu0 %vm183_vm3, %v181_v27  ;;  %289 = vmatmul.msk.bf16.vlgmr.msrb.gmra.mxu1 %vm183_vm3, %v181_v27 }
  0xe0   :  { %v178_v29 = vmul.f32 %v176_v18, %v168_v28 }
  0xe2   :  { %v180_v30 = vadd.f32 %v287_v22, %v178_v29 }
  0xe4   :  { %v182_v31 = vpack.c.bf16 %v180_v30, %v180_v30 }
  0xe6   :  { %290 = vmatmul.msk.bf16.vlgmr.msrb.gmra.mxu2 %vm183_vm3, %v182_v31  ;;  %291 = vmatmul.msk.bf16.vlgmr.msrb.gmra.mxu3 %vm183_vm3, %v182_v31 }
 0x15c   :  { %v203_v32 = vpop.f32.mrf.mxu0  ;;  %v216_v33 = vpop.f32.mrf.mxu1 }
 0x15d   :  { %v259_v34 = vrot.slane %v216_v33, 4 }
 0x15f   :  { %v262_v35 = vsel %vm261_vm4, %v203_v32, %v259_v34 }
 0x160   :  { %266 = vst [vmem:[#allocation6] sm:$0xff] %v262_v35 }
 0x164   :  { %v205_v36 = vpop.f32.mrf.mxu0  ;;  %v218_v37 = vpop.f32.mrf.mxu1 }
 0x169   :  { %v238_v38 = vpop.f32.mrf.mxu2  ;;  %v251_v39 = vpop.f32.mrf.mxu3 }
 0x16a   :  { %v260_v40 = vrot.slane %v251_v39, 4 }
 0x16c   :  { %v263_v41 = vsel %vm261_vm4, %v238_v38, %v260_v40 }
 0x16d   :  { %267 = vst [vmem:[#allocation6 + $0x8] sm:$0xff] %v263_v41 }
 0x16e   :  { %280 = dma.vmem_to_hbm [thread:$0]  %s273_s17, 256, %s275_s20, [#allocation5], %s358_s14, %s358_s14, %s359_s15  }
 0x171   :  { %v240_v42 = vpop.f32.mrf.mxu2  ;;  %v253_v43 = vpop.f32.mrf.mxu3 }
 0x172   :  { %355 = dma.done.wait [#allocation5], 256  }
 0x173   :  { %356 = vsyncadd [#allocation5], 4294967040 }
 0x174   :  { %285 = vsyncpa [#allocation4], 1 }
 0x175   :  { %286 = vsyncpa [#allocation5], 1 }

</bundles_post_ra>
